<compile_context>
chip_gen: v7x
topology: tpu7x:2x2x1
jax: 0.10.0
libtpu: 0.0.40
codegen_flags: <defaults>
</compile_context>

<pallas_src>
import functools
import math

import numpy as np

import jax
import jax.numpy as jnp
from jax import lax
from jax.experimental import pallas as pl
from jax.experimental.pallas import tpu as pltpu


# ----------------------------------------------------------------------------
# Shared in-kernel compute: per-token weight, segment mean, modulation.
# ----------------------------------------------------------------------------
def _segment_weight_and_modulate(x, fcw_ref, fcb_ref, pool_ref, scat_ref,
                                 base, len_seg, n_cov, seq_tile, out_dtype):
    """x: (seq_tile, E) tile in the embedding dtype.  Returns (out, wf)."""
    # fc(E -> 1) + tanh.  The E-reduction runs on the (otherwise idle) MXU so
    # no f32 copy of the tile is ever materialized.
    w_tok = jnp.tanh(
        jnp.dot(x, fcw_ref[...], preferred_element_type=jnp.float32)
        + fcb_ref[...]
    )                                                             # (TS, 1) f32

    # Segment mean inside the tile via the hoisted (grid-invariant) masks.
    seg_mean = jnp.dot(pool_ref[...], w_tok,
                       preferred_element_type=jnp.float32) * (1.0 / len_seg)
    w_seg = jnp.dot(scat_ref[...], seg_mean,
                    preferred_element_type=jnp.float32)           # (TS, 1) f32

    # Tail tokens (global position >= n_cov) keep their per-token weight.
    gpos = base + lax.broadcasted_iota(jnp.int32, (seq_tile, 1), 0)
    wf = jnp.where(gpos < n_cov, w_seg, w_tok)                    # (TS, 1) f32

    # Modulation in the native dtype: out = x * (1 + 0.1 * w).
    scale = (1.0 + 0.1 * wf).astype(x.dtype)
    out = (x * scale).astype(out_dtype)
    return out, wf


# ----------------------------------------------------------------------------
# Path 1: small vocab -> embedding table VMEM-resident, one-hot MXU gather.
# ----------------------------------------------------------------------------
def _emb_mod_resident_kernel(ids_ref,       # (1, TS, 1) int32 tile of token ids
                             emb_ref,       # (V, E) resident table
                             fcw_ref,       # (E, 1) fc weight column
                             fcb_ref,       # (1, 1) fc bias
                             pool_ref,      # (n_blk_pad, TS) pooling mask
                             scat_ref,      # (TS, n_blk_pad) scatter mask
                             out_ref,       # (1, TS, E) modulated embeddings
                             w_ref,         # (1, TS, 1) inputs_weight
                             *, seq_tile, len_seg, n_cov, vocab):
    t = pl.program_id(1)
    ids = ids_ref[0]                                              # (TS, 1) int32
    onehot = (ids == lax.broadcasted_iota(jnp.int32, (seq_tile, vocab), 1)
              ).astype(emb_ref.dtype)                             # (TS, V)
    x = jnp.dot(onehot, emb_ref[...],
                preferred_element_type=jnp.float32).astype(emb_ref.dtype)
    out, wf = _segment_weight_and_modulate(
        x, fcw_ref, fcb_ref, pool_ref, scat_ref, t * seq_tile,
        len_seg, n_cov, seq_tile, out_ref.dtype)
    out_ref[0] = out
    w_ref[0] = wf.astype(w_ref.dtype)


# ----------------------------------------------------------------------------
# Path 2: large vocab -> table stays in HBM, per-row DMAs double-buffered
# across grid steps (prefetch tile t+1 while computing tile t).
# ----------------------------------------------------------------------------
def _emb_mod_hbm_kernel(ids_ref,            # (B*S,) int32 in SMEM (scalar prefetch)
                        emb_hbm,            # (V, E) table, memory_space=ANY (HBM)
                        fcw_ref, fcb_ref, pool_ref, scat_ref,
                        out_ref,            # (1, TS, E)
                        w_ref,              # (1, TS, 1)
                        xbuf,               # VMEM (2, TS, E) double-buffered gather
                        sem,                # DMA semaphores, one per slot
                        *, seq_tile, len_seg, n_cov, seq_len, unroll_issue):
    b = pl.program_id(0)
    t = pl.program_id(1)
    n_t = pl.num_programs(1)
    slot = t % 2

    def row_copy(tile_idx, p, dst_slot):
        tok = ids_ref[b * seq_len + tile_idx * seq_tile + p]
        return pltpu.make_async_copy(emb_hbm.at[tok], xbuf.at[dst_slot, p],
                                     sem.at[dst_slot])

    def for_each_row(fn):
        if unroll_issue:
            # Fully unrolled descriptor issue: no per-iteration scalar-loop
            # overhead on the vector-misc slot.
            for p in range(seq_tile):
                fn(p)
        else:
            @pl.loop(0, seq_tile)
            def _(p):
                fn(p)

    def fetch(tile_idx, dst_slot):
        for_each_row(lambda p: row_copy(tile_idx, p, dst_slot).start())

    def drain(tile_idx, dst_slot):
        # Waits use descriptors identical to the ones issued (same token row,
        # same destination, same semaphore slot).
        for_each_row(lambda p: row_copy(tile_idx, p, dst_slot).wait())

    # Prime the pipeline at the first tile of every batch row.
    @pl.when(t == 0)
    def _():
        fetch(0, 0)

    # Prefetch the next tile of this row into the other slot; it lands while
    # the current tile is being computed / written back.
    @pl.when(t + 1 < n_t)
    def _():
        fetch(t + 1, 1 - slot)

    # Wait for the current tile's rows (issued at step t-1, or just above).
    drain(t, slot)

    x = xbuf[slot]                                                # (TS, E) native dtype
    out, wf = _segment_weight_and_modulate(
        x, fcw_ref, fcb_ref, pool_ref, scat_ref, t * seq_tile,
        len_seg, n_cov, seq_tile, out_ref.dtype)
    out_ref[0] = out
    w_ref[0] = wf.astype(w_ref.dtype)


# ----------------------------------------------------------------------------
# Wrapper.
# ----------------------------------------------------------------------------
def _vmem_capacity_bytes():
    try:
        info = pltpu.get_tpu_info()
        for name in ("vmem_capacity_bytes", "vmem_bytes", "vmem_size_bytes"):
            cap = getattr(info, name, None)
            if cap:
                return int(cap)
    except Exception:
        pass
    return 64 << 20            # conservative (v7x-sized) default


def _pick_seq_tile(S, len_seg, row_bytes, target_bytes):
    """Largest sequence tile dividing S, multiple of len_seg and 8, and whose
    gathered tile stays around `target_bytes`."""
    align = (len_seg * 8) // math.gcd(len_seg, 8)       # lcm(len_seg, 8)
    cands = [ts for ts in range(align, S + 1, align) if S % ts == 0]
    if not cands:
        return S                                        # fallback: one tile per row
    fit = [ts for ts in cands if ts * row_bytes <= target_bytes]
    return max(fit) if fit else min(cands)


def emb_model_forward(input_ids, emb_table, fc_w, fc_b, num_seg, *,
                      seq_tile=None, force_hbm_gather=False):
    """Pallas port of EmbModel.forward up to (and excluding) the LLaMA call.

    Returns (modulated_inputs_embeds (B, S, E), inputs_weight (B, S, 1)).
    """
    B, S = input_ids.shape
    V, E = emb_table.shape
    len_seg = S // num_seg
    assert len_seg >= 1, "num_seg must be <= sequence length"
    n_cov = num_seg * len_seg

    emb_dtype = emb_table.dtype
    emb_isz = jnp.dtype(emb_dtype).itemsize

    # Generation-aware budgets: v5e/v6e have 128 MiB VMEM (big tiles, up to
    # ~64 MiB scoped); v7x has 64 MiB (<= ~32 MiB scoped, smaller tiles).
    vmem_cap = _vmem_capacity_bytes()
    big_vmem = vmem_cap >= (100 << 20)
    target_tile_bytes = (8 << 20) if big_vmem else (3 << 20)
    vmem_limit_max = (64 << 20) if big_vmem else (30 << 20)

    if seq_tile is None:
        seq_tile = _pick_seq_tile(S, len_seg, E * emb_isz, target_tile_bytes)
    assert S % seq_tile == 0, "seq_tile must divide S"
    assert seq_tile == S or (seq_tile % len_seg == 0 and seq_tile % 8 == 0), \
        "seq_tile must be a multiple of len_seg and 8 (or equal to S)"

    T = S // seq_tile
    grid = (B, T)   # On v7x prefer splitting work on B so both TensorCores stay busy.

    # Grid-invariant segment pooling masks, built once on the host and kept
    # VMEM-resident via constant index_maps (no per-step iota rebuild).
    # Padded pool rows are all-zero; any (padded / tail-straddling) block still
    # divides by len_seg, but those positions are overridden by the
    # gpos < n_cov select, so the result is unaffected.
    n_blk = -(-seq_tile // len_seg)
    n_blk_pad = ((n_blk + 7) // 8) * 8
    jj = np.arange(n_blk_pad)[:, None]
    qq = np.arange(seq_tile)[None, :]
    pool_np = ((qq >= jj * len_seg) & (qq < (jj + 1) * len_seg)).astype(np.float32)
    pool = jnp.asarray(pool_np)              # (n_blk_pad, seq_tile)
    scat = jnp.asarray(pool_np.T)            # (seq_tile, n_blk_pad)

    fcw_col = jnp.asarray(fc_w, jnp.float32).reshape(E, 1).astype(emb_dtype)
    fcb11 = jnp.asarray(fc_b, jnp.float32).reshape(1, 1)

    table_bytes = V * E * emb_isz
    resident = (not force_hbm_gather
                and V <= 4096
                and table_bytes <= min(vmem_cap // 8, 8 << 20))

    tile_bytes = seq_tile * E * emb_isz
    const_bytes = (pool.size + scat.size + E + 4) * 4
    if resident:
        vmem_need = 2 * table_bytes + 2 * tile_bytes + 8 * seq_tile + const_bytes
    else:
        vmem_need = 4 * tile_bytes + 8 * seq_tile + const_bytes   # xbuf + out tiles
    vmem_limit = int(min(max(vmem_need + (4 << 20), 16 << 20), vmem_limit_max))

    out_shapes = (jax.ShapeDtypeStruct((B, S, E), emb_dtype),
                  jax.ShapeDtypeStruct((B, S, 1), jnp.float32))

    if resident:
        ids_col = input_ids.astype(jnp.int32).reshape(B, S, 1)
        kernel = functools.partial(
            _emb_mod_resident_kernel, seq_tile=seq_tile, len_seg=len_seg,
            n_cov=n_cov, vocab=V)
        out_embeds, out_weight = pl.pallas_call(
            kernel,
            out_shape=out_shapes,
            grid_spec=pltpu.PrefetchScalarGridSpec(
                num_scalar_prefetch=0,
                grid=grid,
                in_specs=[
                    pl.BlockSpec((1, seq_tile, 1), lambda b, t: (b, t, 0)),
                    pl.BlockSpec((V, E), lambda b, t: (0, 0)),         # resident table
                    pl.BlockSpec((E, 1), lambda b, t: (0, 0)),
                    pl.BlockSpec((1, 1), lambda b, t: (0, 0)),
                    pl.BlockSpec((n_blk_pad, seq_tile), lambda b, t: (0, 0)),
                    pl.BlockSpec((seq_tile, n_blk_pad), lambda b, t: (0, 0)),
                ],
                out_specs=[
                    pl.BlockSpec((1, seq_tile, E), lambda b, t: (b, t, 0)),
                    pl.BlockSpec((1, seq_tile, 1), lambda b, t: (b, t, 0)),
                ],
            ),
            compiler_params=pltpu.CompilerParams(
                # Both axes parallel so v7x's two TensorCores share the grid.
                dimension_semantics=("parallel", "parallel"),
                vmem_limit_bytes=vmem_limit,
            ),
        )(ids_col, emb_table, fcw_col, fcb11, pool, scat)
    else:
        # TODO(synk): for sub-32-bit tables on this manual-gather path, pre-pack
        # each row to uint32 (pltpu.bitcast) so the per-row DMAs stay 32-bit
        # aligned against the packed VMEM layout.
        ids_flat = input_ids.astype(jnp.int32).reshape(B * S)      # 1-D: no SMEM padding
        kernel = functools.partial(
            _emb_mod_hbm_kernel, seq_tile=seq_tile, len_seg=len_seg,
            n_cov=n_cov, seq_len=S, unroll_issue=(seq_tile <= 128))
        out_embeds, out_weight = pl.pallas_call(
            kernel,
            out_shape=out_shapes,
            grid_spec=pltpu.PrefetchScalarGridSpec(
                num_scalar_prefetch=1,                             # flat ids -> SMEM
                grid=grid,
                in_specs=[
                    pl.BlockSpec(memory_space=pl.ANY),             # table stays in HBM
                    pl.BlockSpec((E, 1), lambda b, t, ids: (0, 0)),
                    pl.BlockSpec((1, 1), lambda b, t, ids: (0, 0)),
                    pl.BlockSpec((n_blk_pad, seq_tile), lambda b, t, ids: (0, 0)),
                    pl.BlockSpec((seq_tile, n_blk_pad), lambda b, t, ids: (0, 0)),
                ],
                out_specs=[
                    pl.BlockSpec((1, seq_tile, E), lambda b, t, ids: (b, t, 0)),
                    pl.BlockSpec((1, seq_tile, 1), lambda b, t, ids: (b, t, 0)),
                ],
                scratch_shapes=[
                    pltpu.VMEM((2, seq_tile, E), emb_dtype),       # double-buffered gather
                    pltpu.SemaphoreType.DMA((2,)),                 # one sem per slot
                ],
            ),
            compiler_params=pltpu.CompilerParams(
                # b is megacore-parallel; the sequence axis carries the manual
                # prefetch state -> arbitrary (not core-split).
                dimension_semantics=("parallel", "arbitrary"),
                vmem_limit_bytes=vmem_limit,
            ),
        )(ids_flat, emb_table, fcw_col, fcb11, pool, scat)

    # TODO(synk): self.pre_model(inputs_embeds=..., labels=...) -- the full
    # pretrained LlamaForCausalLM forward + CE loss has no clean single-kernel
    # Pallas equivalent; we return the modulated embeddings (and the weight).
    return out_embeds, out_weight


# ----------------------------------------------------------------------------
# Pure-JAX reference mirroring the PyTorch code line by line.
# ----------------------------------------------------------------------------
def _reference(input_ids, emb_table, fc_w, fc_b, num_seg):
    x = jnp.take(emb_table, input_ids, axis=0).astype(jnp.float32)      # (B, S, E)
    w = jnp.tanh(
        jnp.sum(x * fc_w.reshape(1, 1, -1).astype(jnp.float32),
                axis=-1, keepdims=True)
        + fc_b.astype(jnp.float32).reshape(1, 1, 1))                    # (B, S, 1)
    B, S, _ = x.shape
    len_seg = S // num_seg
    n_cov = num_seg * len_seg
    w1 = w[:, :n_cov, :].reshape(B, num_seg, len_seg)
    w1 = jnp.mean(w1, axis=2)[..., None]
    w1 = jnp.repeat(w1, len_seg, axis=2).reshape(B, n_cov, 1)
    w2 = w[:, n_cov:, :]
    wf = jnp.concatenate([w1, w2], axis=1)                              # (B, S, 1)
    return (x + 0.1 * wf * x).astype(emb_table.dtype), wf


if __name__ == "__main__":
    B, S, E, V = 2, 24, 128, 64
    num_seg = 5            # len_seg = 4 -> 20 covered tokens + 4 tail tokens

    key = jax.random.PRNGKey(0)
    k_ids, k_emb, k_w, k_b = jax.random.split(key, 4)
    input_ids = jax.random.randint(k_ids, (B, S), 0, V, dtype=jnp.int32)
    emb_f32 = jax.random.normal(k_emb, (V, E), dtype=jnp.float32) * 0.1
    fc_w = jax.random.normal(k_w, (1, E), dtype=jnp.float32) * 0.1   # nn.Linear(E,1).weight
    fc_b = jax.random.normal(k_b, (1,), dtype=jnp.float32) * 0.1     # nn.Linear(E,1).bias

    ref_e, ref_w = _reference(input_ids, emb_f32, fc_w, fc_b, num_seg)

    # 1) Small-vocab fast path: table VMEM-resident, one-hot MXU gather,
    #    multi-tile grid (3 sequence tiles per batch row).
    oe, ow = emb_model_forward(input_ids, emb_f32, fc_w, fc_b, num_seg, seq_tile=8)
    oe = jax.block_until_ready(oe)
    ow = jax.block_until_ready(ow)
    assert oe.shape == (B, S, E) and ow.shape == (B, S, 1)
    assert jnp.allclose(oe, ref_e, atol=1e-5, rtol=1e-5)
    assert jnp.allclose(ow, ref_w, atol=1e-4, rtol=1e-4)

    # 2) Large-vocab path (forced): per-row HBM DMAs with cross-step double
    #    buffering and matching-descriptor drains.
    oe, ow = emb_model_forward(input_ids, emb_f32, fc_w, fc_b, num_seg,
                               seq_tile=8, force_hbm_gather=True)
    oe = jax.block_until_ready(oe)
    ow = jax.block_until_ready(ow)
    assert jnp.allclose(oe, ref_e, atol=1e-5, rtol=1e-5)
    assert jnp.allclose(ow, ref_w, atol=1e-4, rtol=1e-4)

    # 3) bf16 table through the resident path with auto tiling (seq_tile == S
    #    here): exercises the sub-32-bit dtype handling and the single-tile case.
    emb_bf16 = emb_f32.astype(jnp.bfloat16)
    ref_e16, ref_w16 = _reference(input_ids, emb_bf16, fc_w, fc_b, num_seg)
    oe, ow = emb_model_forward(input_ids, emb_bf16, fc_w, fc_b, num_seg)
    oe = jax.block_until_ready(oe)
    ow = jax.block_until_ready(ow)
    assert jnp.allclose(oe.astype(jnp.float32), ref_e16.astype(jnp.float32),
                        atol=1e-2, rtol=1e-2)
    assert jnp.allclose(ow, ref_w16, atol=1e-2, rtol=1e-2)

    print("KERNEL_OK")
</pallas_src>

<mosaic_0001>
module attributes {stable_mosaic.version = 11 : i64} {
  func.func @_emb_mod_resident_kernel(%arg0: i32, %arg1: i32, %arg2: memref<1x8x1xi32, #tpu.memory_space<vmem>>, %arg3: memref<64x128xf32, #tpu.memory_space<vmem>>, %arg4: memref<128x1xf32, #tpu.memory_space<vmem>>, %arg5: memref<1x1xf32, #tpu.memory_space<vmem>>, %arg6: memref<8x8xf32, #tpu.memory_space<vmem>>, %arg7: memref<8x8xf32, #tpu.memory_space<vmem>>, %arg8: memref<1x8x128xf32, #tpu.memory_space<vmem>>, %arg9: memref<1x8x1xf32, #tpu.memory_space<vmem>>) attributes {dimension_semantics = [#tpu.dimension_semantics<parallel>, #tpu.dimension_semantics<parallel>], iteration_bounds = array<i64: 2, 3>, scalar_prefetch = 0 : i64, scratch_operands = 0 : i64, tpu.core_type = #tpu.core_type<tc>, window_params = [{transform_indices = @transform_0, window_bounds = array<i64: 1, 8, 1>}, {pipeline_mode = #tpu.pipeline_mode<synchronous>, transform_indices = @transform_1, window_bounds = array<i64: 64, 128>}, {pipeline_mode = #tpu.pipeline_mode<synchronous>, transform_indices = @transform_2, window_bounds = array<i64: 128, 1>}, {pipeline_mode = #tpu.pipeline_mode<synchronous>, transform_indices = @transform_3, window_bounds = array<i64: 1, 1>}, {pipeline_mode = #tpu.pipeline_mode<synchronous>, transform_indices = @transform_4, window_bounds = array<i64: 8, 8>}, {pipeline_mode = #tpu.pipeline_mode<synchronous>, transform_indices = @transform_5, window_bounds = array<i64: 8, 8>}, {transform_indices = @transform_6, window_bounds = array<i64: 1, 8, 128>}, {transform_indices = @transform_7, window_bounds = array<i64: 1, 8, 1>}]} {
    %c0 = arith.constant 0 : index
    %c0_0 = arith.constant 0 : index
    %c0_1 = arith.constant 0 : index
    %0 = vector.load %arg2[%c0, %c0_0, %c0_1] : memref<1x8x1xi32, #tpu.memory_space<vmem>>, vector<1x8x1xi32>
    %1 = vector.shape_cast %0 : vector<1x8x1xi32> to vector<8x1xi32>
    %2 = tpu.iota {dimensions = array<i32: 1>} : vector<8x64xi32>
    %3 = vector.broadcast %1 : vector<8x1xi32> to vector<8x64xi32>
    %4 = arith.cmpi eq, %3, %2 : vector<8x64xi32>
    %5 = arith.extui %4 : vector<8x64xi1> to vector<8x64xi32>
    %6 = arith.sitofp %5 : vector<8x64xi32> to vector<8x64xf32>
    %c0_2 = arith.constant 0 : index
    %c0_3 = arith.constant 0 : index
    %7 = vector.load %arg3[%c0_2, %c0_3] : memref<64x128xf32, #tpu.memory_space<vmem>>, vector<64x128xf32>
    %cst = arith.constant dense<0.000000e+00> : vector<8x128xf32>
    %8 = tpu.matmul %6, %7, %cst {dimension_numbers = #tpu.dot_dimension_numbers<[1], [0], [0], [1], [0, 0, 1, 1], [], []>} : vector<8x64xf32>, vector<64x128xf32>, vector<8x128xf32> -> vector<8x128xf32>
    %c8_i32 = arith.constant 8 : i32
    %9 = arith.muli %arg1, %c8_i32 : i32
    %c0_4 = arith.constant 0 : index
    %c0_5 = arith.constant 0 : index
    %10 = vector.load %arg4[%c0_4, %c0_5] : memref<128x1xf32, #tpu.memory_space<vmem>>, vector<128x1xf32>
    %cst_6 = arith.constant dense<0.000000e+00> : vector<8x1xf32>
    %11 = tpu.matmul %8, %10, %cst_6 {dimension_numbers = #tpu.dot_dimension_numbers<[1], [0], [0], [1], [0, 0, 1, 1], [], []>} : vector<8x128xf32>, vector<128x1xf32>, vector<8x1xf32> -> vector<8x1xf32>
    %c0_7 = arith.constant 0 : index
    %c0_8 = arith.constant 0 : index
    %12 = vector.load %arg5[%c0_7, %c0_8] : memref<1x1xf32, #tpu.memory_space<vmem>>, vector<1x1xf32>
    %13 = vector.broadcast %12 : vector<1x1xf32> to vector<8x1xf32>
    %14 = arith.addf %11, %13 : vector<8x1xf32>
    %15 = math.tanh %14 : vector<8x1xf32>
    %c0_9 = arith.constant 0 : index
    %c0_10 = arith.constant 0 : index
    %16 = vector.load %arg6[%c0_9, %c0_10] : memref<8x8xf32, #tpu.memory_space<vmem>>, vector<8x8xf32>
    %cst_11 = arith.constant dense<0.000000e+00> : vector<8x1xf32>
    %17 = tpu.matmul %16, %15, %cst_11 {dimension_numbers = #tpu.dot_dimension_numbers<[1], [0], [0], [1], [0, 0, 1, 1], [], []>} : vector<8x8xf32>, vector<8x1xf32>, vector<8x1xf32> -> vector<8x1xf32>
    %cst_12 = arith.constant 2.500000e-01 : f32
    %18 = vector.broadcast %cst_12 : f32 to vector<8x1xf32>
    %19 = arith.mulf %17, %18 : vector<8x1xf32>
    %c0_13 = arith.constant 0 : index
    %c0_14 = arith.constant 0 : index
    %20 = vector.load %arg7[%c0_13, %c0_14] : memref<8x8xf32, #tpu.memory_space<vmem>>, vector<8x8xf32>
    %cst_15 = arith.constant dense<0.000000e+00> : vector<8x1xf32>
    %21 = tpu.matmul %20, %19, %cst_15 {dimension_numbers = #tpu.dot_dimension_numbers<[1], [0], [0], [1], [0, 0, 1, 1], [], []>} : vector<8x8xf32>, vector<8x1xf32>, vector<8x1xf32> -> vector<8x1xf32>
    %22 = tpu.iota {dimensions = array<i32: 0>} : vector<8x1xi32>
    %23 = vector.broadcast %9 : i32 to vector<8x1xi32>
    %24 = arith.addi %23, %22 : vector<8x1xi32>
    %c20_i32 = arith.constant 20 : i32
    %25 = vector.broadcast %c20_i32 : i32 to vector<8x1xi32>
    %26 = arith.cmpi slt, %24, %25 : vector<8x1xi32>
    %27 = arith.select %26, %21, %15 : vector<8x1xi1>, vector<8x1xf32>
    %cst_16 = arith.constant 1.000000e-01 : f32
    %28 = vector.broadcast %cst_16 : f32 to vector<8x1xf32>
    %29 = arith.mulf %28, %27 : vector<8x1xf32>
    %cst_17 = arith.constant 1.000000e+00 : f32
    %30 = vector.broadcast %cst_17 : f32 to vector<8x1xf32>
    %31 = arith.addf %30, %29 : vector<8x1xf32>
    %32 = vector.broadcast %31 : vector<8x1xf32> to vector<8x128xf32>
    %33 = arith.mulf %8, %32 : vector<8x128xf32>
    %c0_18 = arith.constant 0 : index
    %c0_19 = arith.constant 0 : index
    %c0_20 = arith.constant 0 : index
    %34 = vector.load %arg8[%c0_18, %c0_19, %c0_20] : memref<1x8x128xf32, #tpu.memory_space<vmem>>, vector<1x8x128xf32>
    %35 = vector.shape_cast %34 : vector<1x8x128xf32> to vector<8x128xf32>
    %36 = vector.shape_cast %33 : vector<8x128xf32> to vector<1x8x128xf32>
    tpu.vector_store %arg8[%c0_18, %c0_19, %c0_20], %36 {strides = array<i32>} : memref<1x8x128xf32, #tpu.memory_space<vmem>>, vector<1x8x128xf32>,
    %c0_21 = arith.constant 0 : index
    %c0_22 = arith.constant 0 : index
    %c0_23 = arith.constant 0 : index
    %37 = vector.load %arg9[%c0_21, %c0_22, %c0_23] : memref<1x8x1xf32, #tpu.memory_space<vmem>>, vector<1x8x1xf32>
    %38 = vector.shape_cast %37 : vector<1x8x1xf32> to vector<8x1xf32>
    %39 = vector.shape_cast %27 : vector<8x1xf32> to vector<1x8x1xf32>
    tpu.vector_store %arg9[%c0_21, %c0_22, %c0_23], %39 {strides = array<i32>} : memref<1x8x1xf32, #tpu.memory_space<vmem>>, vector<1x8x1xf32>,
    return
  }
  func.func @transform_0(%arg0: i32, %arg1: i32) -> (i32, i32, i32) {
    %c0_i32 = arith.constant 0 : i32
    %c0_i32_0 = arith.constant 0 : i32
    return %arg0, %arg1, %c0_i32 : i32, i32, i32
  }
  func.func @transform_1(%arg0: i32, %arg1: i32) -> (i32, i32) {
    %c0_i32 = arith.constant 0 : i32
    %c0_i32_0 = arith.constant 0 : i32
    %c0_i32_1 = arith.constant 0 : i32
    return %c0_i32, %c0_i32_0 : i32, i32
  }
  func.func @transform_2(%arg0: i32, %arg1: i32) -> (i32, i32) {
    %c0_i32 = arith.constant 0 : i32
    %c0_i32_0 = arith.constant 0 : i32
    %c0_i32_1 = arith.constant 0 : i32
    return %c0_i32, %c0_i32_0 : i32, i32
  }
  func.func @transform_3(%arg0: i32, %arg1: i32) -> (i32, i32) {
    %c0_i32 = arith.constant 0 : i32
    %c0_i32_0 = arith.constant 0 : i32
    %c0_i32_1 = arith.constant 0 : i32
    return %c0_i32, %c0_i32_0 : i32, i32
  }
  func.func @transform_4(%arg0: i32, %arg1: i32) -> (i32, i32) {
    %c0_i32 = arith.constant 0 : i32
    %c0_i32_0 = arith.constant 0 : i32
    %c0_i32_1 = arith.constant 0 : i32
    return %c0_i32, %c0_i32_0 : i32, i32
  }
  func.func @transform_5(%arg0: i32, %arg1: i32) -> (i32, i32) {
    %c0_i32 = arith.constant 0 : i32
    %c0_i32_0 = arith.constant 0 : i32
    %c0_i32_1 = arith.constant 0 : i32
    return %c0_i32, %c0_i32_0 : i32, i32
  }
  func.func @transform_6(%arg0: i32, %arg1: i32) -> (i32, i32, i32) {
    %c0_i32 = arith.constant 0 : i32
    %c0_i32_0 = arith.constant 0 : i32
    return %arg0, %arg1, %c0_i32 : i32, i32, i32
  }
  func.func @transform_7(%arg0: i32, %arg1: i32) -> (i32, i32, i32) {
    %c0_i32 = arith.constant 0 : i32
    %c0_i32_0 = arith.constant 0 : i32
    return %arg0, %arg1, %c0_i32 : i32, i32, i32
  }
}

</mosaic_0001>

<bundles_post_ra>
// kernel: tpu_custom_call.1
= control target key start
LH: loop header
LB: loop body
LE: loop exit
PB: predicated region body
PF: predicated region fallthrough
CT: control target
= control target key end

     0   :  { %s1440_s0 = inlined_call_operand.vmem [shape: s32[2,24,1], index: 0, kind: input, shape index: {}]   ;;  %s1441_s1 = inlined_call_operand.vmem [shape: f32[64,128], index: 1, kind: input, shape index: {}]   ;;  %s1442_s2 = inlined_call_operand.vmem [shape: f32[128,1], index: 2, kind: input, shape index: {}]   ;;  %s1443_s3 = inlined_call_operand.<no memory space> [shape: f32[1,1], index: 3, kind: input, shape index: {}]   ;;  %s1444_s4 = inlined_call_operand.vmem [shape: f32[8,8], index: 4, kind: input, shape index: {}]   ;;  %s1445_s5 = inlined_call_operand.vmem [shape: f32[8,8], index: 5, kind: input, shape index: {}]   ;;  %s1446_s6 = inlined_call_operand.hbm [shape: f32[2,24,128], index: 6, kind: output, shape index: {0}]   ;;  %s1447_s7 = inlined_call_operand.vmem [shape: f32[2,24,1], index: 7, kind: output, shape index: {1}]  }
   0x1   :  { %v13_v0 = vstv %s1443_s3 }
   0x2   :  { %14 = vst [vmem:[#allocation2] sm:$0x1] %v13_v0 }
   0x3   :  { %15 = vsyncpa [#allocation4], 0 }
   0x4   :  { %17 = vsyncpa [#allocation4 + $0x1], 0  ;;  %s1191_s26 = smov 0   ;;  %s1193_s27 = smov 0  }
   0x5   :  { %s1195_s28 = smov 0   ;;  %s1197_s29 = smov 0  }
   0x6   :  { %s1199_s30 = smov 0   ;;  %s1201_s8 = smov 0  }
   0x7   :  { %s1203_s9 = smov 0   ;;  %s1205_s10 = smov 0  }
   0x8 LB: > { %s819_s3 = sadd.s32 4294967295, %s1141_s10   ;;  %s820_s11 = sadd.s32 4294967294, %s1141_s10   ;;  %s1141_s10 = sphi %s1205_s10, %s23_s10   ;;  %s1137_s9 = sphi %s1203_s9, %s1456_s9   ;;  %s1133_s8 = sphi %s1201_s8, %s1455_s8   ;;  %s1129_s30 = sphi %s1199_s30, %s1454_s30   ;;  %s1125_s29 = sphi %s1197_s29, %s1453_s29   ;;  %s1121_s28 = sphi %s1195_s28, %s1452_s28   ;;  %s1117_s27 = sphi %s1193_s27, %s1451_s27   ;;  %s1113_s26 = sphi %s1191_s26, %s1450_s26  }
   0x9   : > { %s32_s12 = sadd.s32 1, %s1133_s8  ;;  %s35_s13 = sadd.s32 1, %s1137_s9 }
   0xa   : > { %p33_p0 = scmp.ge.s32.totalorder %s32_s12, 3  ;;  %p187_p1 = scmp.ne.s32.totalorder %s1121_s28, %s1117_s27 }
   0xb   : > { %p188_p2 = scmp.eq.s32.totalorder %s819_s3, 5  ;;  %p193_p5 = scmp.ne.s32.totalorder %s1117_s27, %s1113_s26 }
   0xc   : > { %s1458_s12 = smov (%p33_p0, %s32_s12), 0  ;;  %s1460_s13 = smov (!%p33_p0, %s35_s13), %s1137_s9 }
   0xd   : > { %s173_s14 = ssub.s32 %s1133_s8, %s1458_s12  ;;  %p1242_p3 = por %p188_p2, %p187_p1 }
   0xe   : > { %p37_p4 = scmp.ge.s32.totalorder %s1460_s13, 2  ;;  %p194_p6 = scmp.eq.s32.totalorder %s820_s11, 5 }
   0xf   : > { %p823_p7 = scmp.ge.s32.totalorder %s1141_s10, 1  ;;  %p266_p9 = scmp.lt.s32.totalorder %s1141_s10, 7 }
  0x10   : > { %s1462_s13 = smov (%p37_p4, %s1460_s13), 0  ;;  %p1251_p8 = por %p194_p6, %p193_p5 }
  0x11   : > { %s172_s17 = ssub.s32 %s1137_s9, %s1462_s13  ;;  %s177_s18 = sadd.s32 1, %s1121_s28 }
  0x12   : > { %s174_s19 = sor.u32 %s173_s14, %s172_s17  ;;  %p267_p10 = pnand %p823_p7, %p266_p9 }
  0x13   : > { %p175_p11 = scmp.eq.s32.totalorder %s174_s19, 0  ;;  %p309_p12 = scmp.lt.s32.totalorder (!%p267_p10), %s1129_s30, 1  ;;  %v334_v1 = vld [vmem:[%s1441_s1] sm:$0xff] (!%p267_p10)  ;;  %v335_v2 = vld [vmem:[%s1441_s1 + $0x8] sm:$0xff] (!%p267_p10)  ;;  %v1143_v3 = vmov (!%p267_p10), 0   ;;  %v1144_v4 = vmov (!%p267_p10), 0.0|0.0   ;;  %v326_v41 = vlaneseq (!%p267_p10) }
  0x14   : > { %270 = sbr.rel (%p267_p10) target bundleno = 1179 (0x49b), region = 44  ;;  %p311_p13 = scmp.lt.s32.totalorder (!%p267_p10), %s1125_s29, 2  ;;  %1044 = vset.pattern.permute.xlu0 (!%p267_p10), %v1143_v3  ;;  %931 = vmatprep.subr.bf16.mxu0 (!%p267_p10), %v1144_v4  ;;  %v932_v5 = vpack.c.bf16 (!%p267_p10), %v335_v2, %v334_v1  ;;  %v336_v6 = vld [vmem:[%s1441_s1 + $0x10] sm:$0xff] (!%p267_p10)  ;;  %v337_v7 = vld [vmem:[%s1441_s1 + $0x18] sm:$0xff] (!%p267_p10)  ;;  %v338_v9 = vld [vmem:[%s1441_s1 + $0x20] sm:$0xff] (!%p267_p10)  ;;  %vm1145_vm0 = vmmov (!%p267_p10), 0  }
  0x15   : > { %s1260_s20 = scalar_select %p175_p11, %s1121_s28, %s177_s18  }
  0x16   : > { %943 = vmatprep.subr.bf16.mxu1 (!%p267_p10), %v1144_v4  ;;  %933 = vmatpush3.bf16.msra.mxu0 (!%p267_p10), %v932_v5  ;;  %v935_v8 = vpack.c.bf16 (!%p267_p10), %v337_v7, %v336_v6  ;;  %v339_v10 = vld [vmem:[%s1441_s1 + $0x28] sm:$0xff] (!%p267_p10)  ;;  %v340_v12 = vld [vmem:[%s1441_s1 + $0x30] sm:$0xff] (!%p267_p10)  ;;  %v341_v13 = vld [vmem:[%s1441_s1 + $0x38] sm:$0xff] (!%p267_p10)  ;;  %v1146_v16 = vmov (!%p267_p10), 0.0   ;;  %v327_v42 = vand.u32 (!%p267_p10), 127, %v326_v41  ;;  %vm342_vm1 = vcmask (!%p267_p10), 523264  }
  0x17   : > { %934 = vmatprep.subr.bf16.mxu0 (!%p267_p10), %v1144_v4  ;;  %v938_v11 = vpack.c.bf16 (!%p267_p10), %v339_v10, %v338_v9  ;;  %v941_v15 = vpack.c.bf16 (!%p267_p10), %v341_v13, %v340_v12  ;;  %883 = vmatprep.mubr.msk.f32.mxu0 (!%p267_p10), %vm1145_vm0, %v1146_v16  ;;  %v417_v17 = vld [vmem:[%s1442_s2] sm:$0xff] (!%p267_p10)  ;;  %v418_v18 = vld [vmem:[%s1442_s2 + $0x8] sm:$0xff] (!%p267_p10)  ;;  %v419_v19 = vld [vmem:[%s1442_s2 + $0x10] sm:$0xff] (!%p267_p10)  ;;  %vm512_vm3 = vcmask (!%p267_p10), 64512   ;;  %v662_v57 = vshrl.u32 (!%p267_p10), %v326_v41, 7  ;;  %s296_s21 = sand.u32 (!%p267_p10), 1, %s1117_s27  }
  0x18   : > { %918 = vmatprep.mubr.msk.f32.mxu1 (!%p267_p10), %vm1145_vm0, %v1146_v16  ;;  %v944_v20 = vpack.c.bf16 (!%p267_p10), %v418_v18, %v417_v17  ;;  %v420_v21 = vld [vmem:[%s1442_s2 + $0x18] sm:$0xff] (!%p267_p10)  ;;  %v421_v23 = vld [vmem:[%s1442_s2 + $0x20] sm:$0xff] (!%p267_p10)  ;;  %v422_v24 = vld [vmem:[%s1442_s2 + $0x28] sm:$0xff] (!%p267_p10)  ;;  %vm676_vm5 = vcmask (!%p267_p10), 7168   ;;  %s824_s22 = sshll.u32 (!%p267_p10), %s296_s21, 3 }
  0x19   : > { %v947_v22 = vpack.c.bf16 (!%p267_p10), %v420_v21, %v419_v19  ;;  %v950_v25 = vpack.c.bf16 (!%p267_p10), %v422_v24, %v421_v23  ;;  %v423_v26 = vld [vmem:[%s1442_s2 + $0x30] sm:$0xff] (!%p267_p10)  ;;  %v424_v27 = vld [vmem:[%s1442_s2 + $0x38] sm:$0xff] (!%p267_p10)  ;;  %v425_v29 = vld [vmem:[%s1442_s2 + $0x40] sm:$0xff] (!%p267_p10) }
  0x1a   : > { %936 = vmatpush3.bf16.msra.mxu0 (!%p267_p10), %v935_v8  ;;  %945 = vmatpush3.bf16.msra.mxu1 (!%p267_p10), %v944_v20  ;;  %v953_v28 = vpack.c.bf16 (!%p267_p10), %v424_v27, %v423_v26  ;;  %v426_v30 = vld [vmem:[%s1442_s2 + $0x48] sm:$0xff] (!%p267_p10)  ;;  %v427_v32 = vld [vmem:[%s1442_s2 + $0x50] sm:$0xff] (!%p267_p10)  ;;  %v428_v33 = vld [vmem:[%s1442_s2 + $0x58] sm:$0xff] (!%p267_p10) }
  0x1b   : > { %s310_s17 = scalar_select %p309_p12, %s1129_s30, 1  ;;  %937 = vmatprep.subr.bf16.mxu0 %v1144_v4  ;;  %946 = vmatprep.subr.bf16.mxu1 %v1144_v4  ;;  %v956_v31 = vpack.c.bf16 %v426_v30, %v425_v29  ;;  %v959_v34 = vpack.c.bf16 %v428_v33, %v427_v32  ;;  %v429_v35 = vld [vmem:[%s1442_s2 + $0x60] sm:$0xff]  ;;  %v430_v36 = vld [vmem:[%s1442_s2 + $0x68] sm:$0xff]  ;;  %v431_v38 = vld [vmem:[%s1442_s2 + $0x70] sm:$0xff] }
  0x1c   : > { %s312_s18 = scalar_select %p311_p13, %s1125_s29, 2  ;;  %v962_v37 = vpack.c.bf16 %v430_v36, %v429_v35  ;;  %v432_v39 = vld [vmem:[%s1442_s2 + $0x78] sm:$0xff]  ;;  %v830_v47 = vld [vmem:[#allocation2] ss:$0 sm:$0xff] }
  0x1d   : > { %s967_s19 = smul.u32 3, %s310_s17  ;;  %v965_v40 = vpack.c.bf16 %v432_v39, %v431_v38  ;;  %v511_v51 = vld [vmem:[%s1444_s4] sm:$0xff] }
  0x1e   : > { %939 = vmatpush3.bf16.msra.mxu0 %v938_v11  ;;  %948 = vmatpush3.bf16.msra.mxu1 %v947_v22  ;;  %v587_v56 = vld [vmem:[%s1445_s5] sm:$0xff] }
  0x1f   : > { %s1287_s25 = sadd.s32 %s967_s19, %s312_s18  ;;  %940 = vmatprep.subr.bf16.mxu0 %v1144_v4  ;;  %949 = vmatprep.subr.bf16.mxu1 %v1144_v4  ;;  %s829_s18 = sshll.u32 %s1125_s29, 3 }
  0x20   : > { %s825_s3 = sshll.u32 %s1287_s25, 3  ;;  %v663_v58 = vstv %s829_s18  ;;  %s298_s18 = scalar_lea.vmem [#allocation3], %s824_s22 }
  0x21   : > { %s316_s17 = scalar_lea.vmem %s1440_s0, %s825_s3  ;;  %v664_v59 = vadd.s32 %v663_v58, %v662_v57  ;;  %s324_s14 = scalar_lea.vmem %s1447_s7, %s825_s3 }
  0x22   : > { %v325_v14 = vld [vmem:[%s316_s17] sm:$0xff]  ;;  %942 = vmatpush3.bf16.msra.mxu0 %v941_v15  ;;  %951 = vmatpush3.bf16.msra.mxu1 %v950_v25  ;;  %s968_s17 = smul.u32 3, %s1129_s30  ;;  %s702_s25 = sshll.u32 %s298_s18, 4  ;;  %s1389_s25 = int_to_ptr.vmem [resolvable:$true] %s702_s25 }
  0x23   : > { %329 = vperm.xlu0 %1044, %v325_v14   ;;  %921 = vmatprep.subr.mxu0 %v1146_v16  ;;  %vm665_vm4 = vcmp.lt.s32.totalorder %v664_v59, 20  ;;  %s1047_s30 = scalar_lea.vmem %s1389_s25, 128 }
  0x24   : > { %952 = vmatprep.subr.bf16.mxu1 %v1144_v4  ;;  %s698_s23 = sadd.s32 %s1125_s29, %s968_s17  ;;  %p1048_p0 = scmp.ne.s32.totalorder %s1389_s25, %s1047_s30 }
  0x25   : > { %s834_s24 = sshll.u32 %s698_s23, 7  ;;  %s1147_s29 = smov [#allocation3]  }
  0x26   : > { %954 = vmatpush3.bf16.msra.mxu1 %v953_v28  ;;  %s1387_s11 = scalar_lea.hbm %s1446_s6, %s834_s24  ;;  %p1049_p1 = pnand %p1048_p0, %p1242_p3 }
  0x27   : > { %955 = vmatprep.subr.bf16.mxu1 %v1144_v4  ;;  %s1051_s17 = sshll.u32 %s1147_s29, 4  ;;  %s1052_s17 = int_to_ptr.vmem [resolvable:$false] %s1051_s17 }
  0x28   : > { %p1050_p2 = pneg %p1049_p1  ;;  %s1053_s22 = scalar_lea.vmem %s1052_s17, 256 }
  0x29   : > { %p1054_p4 = scmp.lt.s32.totalorder %s1389_s25, %s1052_s17  ;;  %p1055_p5 = scmp.lt.s32.totalorder %s1053_s22, %s1047_s30 }
  0x2a   : > { %957 = vmatpush3.bf16.msra.mxu1 %v956_v31 }
  0x2b   : > { %958 = vmatprep.subr.bf16.mxu1 %v1144_v4  ;;  %p1056_p6 = por %p1055_p5, %p1054_p4 }
  0x2d   : > { %p1057_p7 = pnand %p1056_p6, %p1050_p2 }
  0x2e   : > { %960 = vmatpush3.bf16.msra.mxu1 %v959_v34 }
  0x2f   : > { %961 = vmatprep.subr.bf16.mxu1 %v1144_v4 }
  0x32   : > { %963 = vmatpush3.bf16.msra.mxu1 %v962_v37 }
  0x33   : > { %964 = vmatprep.subr.bf16.mxu1 %v1144_v4 }
  0x36   : > { %966 = vmatpush3.bf16.msra.mxu1 %v965_v40 }
  0xa2   : > { %v330_v43 = vpop.permute.xlu0 %329 }
  0xa3   : > { %vm331_vm2 = vcmp.eq.s32.totalorder %v330_v43, %v327_v42 }
  0xa4   : > { %v827_v44 = vsel %vm331_vm2, 1.0, %v1146_v16 }
  0xa5   : > { %884 = vmatmul.mubr.msk.f32.vlgmr.msra.gmra.mrb[0].mxu0 %vm342_vm1, %v827_v44 }
  0xa6   : > { %923 = vmatprep.mubr.msk.f32.mxu0 %vm1145_vm0, %v1146_v16 }
 0x178   : > { %v412_v45 = vpop.f32.mrb[0].mxu0 }
 0x179   : > { %v885_v46 = vpop.f32.mrb[1].mxu0  ;;  %919 = vmatmul.mubr.f32.vlgmr.msra.gmra.mrb[0].mxu1 %v412_v45 }
 0x24c   : > { %v506_v48 = vpop.f32.mrb[0].mxu1 }
 0x24d   : > { %v507_v49 = vadd.f32 %v830_v47, %v506_v48  ;;  %v920_v50 = vpop.f32.mrb[1].mxu1 }
 0x24f   : > { %1045 = vtanh.f32 %v507_v49 }
 0x259   : > { %v1046_v52 = vpop.eup %1045 }
 0x25a   : > { %922 = vmatpush3.msra.mxu0 %v1046_v52 }
 0x25b   : > { %924 = vmatmul.mubr.msk.f32.vlgmr.msra.gmra.mrb[2].mxu0 %vm512_vm3, %v511_v51  ;;  %926 = vmatprep.subr.mxu0 %v1146_v16 }
 0x25c   : > { %928 = vmatprep.mubr.msk.f32.mxu0 %vm1145_vm0, %v1146_v16 }
 0x32e   : > { %v582_v53 = vpop.f32.mrb[2].mxu0 }
 0x32f   : > { %v586_v54 = vmul.f32 0.25, %v582_v53  ;;  %v925_v55 = vpop.f32.mrb[3].mxu0 }
 0x331   : > { %927 = vmatpush3.msra.mxu0 %v586_v54 }
 0x332   : > { %929 = vmatmul.mubr.msk.f32.vlgmr.msra.gmra.mrb[4].mxu0 %vm512_vm3, %v587_v56 }
 0x405   : > { %v657_v60 = vpop.f32.mrb[4].mxu0 }
 0x406   : > { %v666_v61 = vsel %vm665_vm4, %v657_v60, %v1046_v52  ;;  %v930_v62 = vpop.f32.mrb[5].mxu0 }
 0x407   : > { %v667_v63 = vmul.f32 0.1, %v666_v61  ;;  %677 = vst.msk [vmem:[%s324_s14] sm:$0xff] %vm676_vm5, %v666_v61  ;;  %s679_s14 = scalar_lea.sflag [#allocation4], %s296_s21 }
 0x409   : > { %v668_v0 = vadd.f32 1.0, %v667_v63 }
 0x40b   : > { %671 = vperm.xlu0 %1044, %v668_v0  }
 0x48a   : > { %v672_v1 = vpop.permute.xlu0 %671 }
 0x48b   : > { %v674_v2 = vmul.f32 %v672_v1, %v412_v45 }
 0x48d   : > { %675 = vst [vmem:[%s298_s18] sm:$0xff] %v674_v2 }
 0x48e   : > { %1060 = shalt.err (!%p1057_p7)
}
 0x48f   : > { %s1061_s21 = scalar_lea.hbm %s1387_s11, 128  ;;  %s1065_s18 = scalar_lea.hbm %s1446_s6, 768 }
 0x490   : > { %p1062_p9 = scmp.ne.s32.totalorder %s1387_s11, %s1061_s21  ;;  %p1066_p12 = scmp.lt.u32.totalorder %s1387_s11, %s1446_s6 }
 0x491   : > { %p1067_p13 = scmp.lt.u32.totalorder %s1065_s18, %s1061_s21  ;;  %p1069_p1 = scmp.lt.u32.totalorder %s1061_s21, %s1387_s11 }
 0x492   : > { %p1063_p10 = pnand %p1062_p9, %p1242_p3 }
 0x493   : > { %p1068_p0 = por %p1067_p13, %p1066_p12 }
 0x494   : > { %p1064_p11 = pneg %p1063_p10 }
 0x495   : > { %p1070_p2 = por %p1069_p1, %p1068_p0 }
 0x497   : > { %p1071_p4 = pnand %p1070_p2, %p1064_p11 }
 0x499   : > { %1074 = shalt.err (!%p1071_p4)
}
 0x49a   : > { %969 = dma.vmem_to_hbm [thread:$0]  (%p1242_p3), %s1389_s25, 128, %s1387_s11, %s679_s14  }
 0x49b PF: > { %p975_p5 = scmp.ge.s32.totalorder %s1141_s10, 2  ;;  %s717_s30 = sand.u32 1, %s1113_s26  }
 0x49c   : > { %s718_s29 = scalar_lea.sflag [#allocation4], %s717_s30 }
 0x49d   : > { %p972_p6 = pnand %p975_p5, %p1251_p8 }
 0x49f   : > { %1108 = dma.done.wait (!%p972_p6), %s718_s29, 128  }
 0x4a0   : > { %1110 = vsyncadd (!%p972_p6), %s718_s29, 4294967168  ;;  %s23_s10 = sadd.s32 1, %s1141_s10   ;;  %s1450_s26 = smov %s1117_s27 }
 0x4a1   : > { %p20_p7 = scmp.ge.s32.totalorder %s23_s10, 8   ;;  %s1451_s27 = smov %s1121_s28 }
 0x4a2   : > { %s1452_s28 = smov %s1260_s20  ;;  %s1453_s29 = smov %s1133_s8 }
 0x4a3   : > { %s1454_s30 = smov %s1137_s9  ;;  %s1455_s8 = smov %s1458_s12 }
 0x4a4   : > { %s1456_s9 = smov %s1462_s13  ;;  %22 = sbr.rel (!%p20_p7) target bundleno = 8 (0x8), region = 91 }
 0x4ab   :  { %734 = vsyncpa [#allocation4], 1 }
 0x4ac   :  { %736 = vsyncpa [#allocation4 + $0x1], 1 }

</bundles_post_ra>
